<compile_context>
chip_gen: v5e
topology: v5e:2x2
jax: 0.10.0
libtpu: 0.0.40
codegen_flags: <defaults>
</compile_context>

<pallas_src>
import math

import jax
import jax.numpy as jnp
from jax.experimental import pallas as pl
from jax.experimental.pallas import tpu as pltpu


def _round_up(a: int, b: int) -> int:
    return ((a + b - 1) // b) * b


def _linear_grt_kernel(x_ref, theta_ref, inv_norm_ref, o_ref):
    """out_tile = (x_tile @ theta_tile) * inv_norm_tile (f32 accumulate on MXU)."""
    acc = jnp.dot(x_ref[...], theta_ref[...],
                  preferred_element_type=jnp.float32)        # [tm, tn] f32
    o_ref[...] = (acc * inv_norm_ref[...]).astype(o_ref.dtype)


def linear_grt_forward(x, theta):
    """Pallas implementation of LinearGRT.forward (projection_dim == -1)."""
    *lead, k = x.shape
    kk, d = theta.shape
    assert k == kk, "in_features mismatch"
    m = math.prod(lead) if lead else 1
    x2d = x.reshape(m, k)

    # --- hoisted column inverse-norms (rsqrt, tiny D-vector, pure JAX) ---
    theta_f32 = theta.astype(jnp.float32)
    inv_norm = jax.lax.rsqrt(jnp.sum(theta_f32 * theta_f32, axis=0))   # [d]

    # --- tile / pad sizes ---
    # tm: multiple of 8 (sublane rule); capped so big-M problems get a real
    #     pipelined grid. tn: lane-dense (multiple of 128).
    tm = min(256, _round_up(m, 8))
    m_pad = _round_up(m, tm)
    d_pad = _round_up(d, 128)
    tn = 256 if d_pad % 256 == 0 else 128

    if m_pad != m:
        x2d = jnp.pad(x2d, ((0, m_pad - m), (0, 0)))
    theta_p = theta
    inv_p = inv_norm
    if d_pad != d:
        # Padded columns are zeros -> their dot output is 0; inv_norm padded
        # with 1.0 so the scale stays finite.
        theta_p = jnp.pad(theta, ((0, 0), (0, d_pad - d)))
        inv_p = jnp.pad(inv_norm, (0, d_pad - d), constant_values=1.0)
    inv_p = inv_p.reshape(1, d_pad).astype(jnp.float32)

    grid = (m_pad // tm, d_pad // tn)

    out2d = pl.pallas_call(
        _linear_grt_kernel,
        out_shape=jax.ShapeDtypeStruct((m_pad, d_pad), x.dtype),
        grid_spec=pltpu.PrefetchScalarGridSpec(
            num_scalar_prefetch=0,
            grid=grid,
            in_specs=[
                pl.BlockSpec((tm, k), lambda i, j: (i, 0)),     # x rows tile
                pl.BlockSpec((k, tn), lambda i, j: (0, j)),     # theta cols tile
                pl.BlockSpec((1, tn), lambda i, j: (0, j)),     # inv_norm tile
            ],
            out_specs=pl.BlockSpec((tm, tn), lambda i, j: (i, j)),
        ),
        compiler_params=pltpu.CompilerParams(
            dimension_semantics=("parallel", "parallel"),
        ),
    )(x2d, theta_p, inv_p)

    out2d = out2d[:m, :d]
    return out2d.reshape(*lead, d)


class LinearGRT:
    """JAX/Pallas port of the PyTorch LinearGRT."""

    def __init__(self, in_features, directions, key):
        # torch.randn(in_features, directions) -> deterministic normal init
        self.theta = jax.random.normal(
            key, (in_features, directions), dtype=jnp.float32
        )

    def reset_parameters(self, key):
        self.theta = jax.random.normal(key, self.theta.shape, dtype=jnp.float32)

    def set_theta(self, theta):
        assert self.theta.shape == theta.shape
        self.theta = theta

    def __call__(self, x, projection_dim=-1):
        if projection_dim != -1:
            # Move projection_dim to last, project, move back (pure-JAX glue).
            x = jnp.moveaxis(x, projection_dim, -1)
            out = linear_grt_forward(x, self.theta)
            return jnp.moveaxis(out, -1, projection_dim)
        return linear_grt_forward(x, self.theta)

    def gsw(self, x, y):
        """Generalized sliced Wasserstein: mse(sort(proj(x)), sort(proj(y)))."""
        assert x.shape == y.shape
        x_slice = self(x)
        y_slice = self(y)
        # TODO(synk): sort+MSE kept as plain-JAX glue (no clean small fused
        # in-kernel sort for arbitrary D); projections round-trip through HBM.
        x_sorted = jnp.sort(x_slice, axis=-1)
        y_sorted = jnp.sort(y_slice, axis=-1)
        return jnp.mean((x_sorted - y_sorted) ** 2)


class PolyGRT:
    """Port of the PyTorch PolyGRT — its forward is an empty stub."""

    def __init__(self, requires_grad=False):
        pass

    def reset_parameters(self):
        pass

    def set_theta(self, theta):
        pass

    def __call__(self, x):
        # TODO(synk): PolyGRT.forward is `pass` (returns None) in the reference;
        # there is no compute to translate, so we mirror the stub.
        return None


if __name__ == "__main__":
    key = jax.random.PRNGKey(0)
    kx, ky, kt, k2 = jax.random.split(key, 4)

    batch, seq, in_features, directions = 2, 8, 32, 16
    x = jax.random.normal(kx, (batch, seq, in_features), dtype=jnp.float32)
    y = jax.random.normal(ky, (batch, seq, in_features), dtype=jnp.float32)

    grt = LinearGRT(in_features, directions, kt)

    # Forward (Pallas kernel) + reference check.
    out = jax.block_until_ready(grt(x))
    ref = x @ (grt.theta / jnp.linalg.norm(grt.theta, axis=0, keepdims=True))
    assert out.shape == (batch, seq, directions)
    assert jnp.allclose(out, ref, atol=1e-5, rtol=1e-4), "kernel mismatch vs reference"

    # Shape whose flattened row count (15) is not a multiple of 8 -> exercises
    # the M-padding / slice-off path.
    x_odd = jax.random.normal(k2, (3, 5, in_features), dtype=jnp.float32)
    out_odd = jax.block_until_ready(grt(x_odd))
    ref_odd = x_odd @ (grt.theta / jnp.linalg.norm(grt.theta, axis=0, keepdims=True))
    assert out_odd.shape == (3, 5, directions)
    assert jnp.allclose(out_odd, ref_odd, atol=1e-5, rtol=1e-4), "padded-path mismatch"

    # gsw path (projection kernel + sort/MSE glue).
    loss = jax.block_until_ready(grt.gsw(x, y))
    assert loss.shape == ()

    # PolyGRT itself is a stub (forward == pass).
    poly = PolyGRT()
    assert poly(x) is None

    print("KERNEL_OK")
</pallas_src>

<mosaic_0001>
module attributes {stable_mosaic.version = 11 : i64} {
  func.func @_linear_grt_kernel(%arg0: i32, %arg1: i32, %arg2: memref<16x32xf32, #tpu.memory_space<vmem>>, %arg3: memref<32x128xf32, #tpu.memory_space<vmem>>, %arg4: memref<1x128xf32, #tpu.memory_space<vmem>>, %arg5: memref<16x128xf32, #tpu.memory_space<vmem>>) attributes {dimension_semantics = [#tpu.dimension_semantics<parallel>, #tpu.dimension_semantics<parallel>], iteration_bounds = array<i64: 1, 1>, scalar_prefetch = 0 : i64, scratch_operands = 0 : i64, tpu.core_type = #tpu.core_type<tc>, window_params = [{transform_indices = @transform_0, window_bounds = array<i64: 16, 32>}, {transform_indices = @transform_1, window_bounds = array<i64: 32, 128>}, {transform_indices = @transform_2, window_bounds = array<i64: 1, 128>}, {transform_indices = @transform_3, window_bounds = array<i64: 16, 128>}]} {
    %c0 = arith.constant 0 : index
    %c0_0 = arith.constant 0 : index
    %0 = vector.load %arg2[%c0, %c0_0] : memref<16x32xf32, #tpu.memory_space<vmem>>, vector<16x32xf32>
    %c0_1 = arith.constant 0 : index
    %c0_2 = arith.constant 0 : index
    %1 = vector.load %arg3[%c0_1, %c0_2] : memref<32x128xf32, #tpu.memory_space<vmem>>, vector<32x128xf32>
    %cst = arith.constant dense<0.000000e+00> : vector<16x128xf32>
    %2 = tpu.matmul %0, %1, %cst {dimension_numbers = #tpu.dot_dimension_numbers<[1], [0], [0], [1], [0, 0, 1, 1], [], []>} : vector<16x32xf32>, vector<32x128xf32>, vector<16x128xf32> -> vector<16x128xf32>
    %c0_3 = arith.constant 0 : index
    %c0_4 = arith.constant 0 : index
    %3 = vector.load %arg4[%c0_3, %c0_4] : memref<1x128xf32, #tpu.memory_space<vmem>>, vector<1x128xf32>
    %4 = vector.broadcast %3 : vector<1x128xf32> to vector<16x128xf32>
    %5 = arith.mulf %2, %4 : vector<16x128xf32>
    %c0_5 = arith.constant 0 : index
    %c0_6 = arith.constant 0 : index
    %6 = vector.load %arg5[%c0_5, %c0_6] : memref<16x128xf32, #tpu.memory_space<vmem>>, vector<16x128xf32>
    tpu.vector_store %arg5[%c0_5, %c0_6], %5 {strides = array<i32>} : memref<16x128xf32, #tpu.memory_space<vmem>>, vector<16x128xf32>,
    return
  }
  func.func @transform_0(%arg0: i32, %arg1: i32) -> (i32, i32) {
    %c0_i32 = arith.constant 0 : i32
    %c0_i32_0 = arith.constant 0 : i32
    return %arg0, %c0_i32 : i32, i32
  }
  func.func @transform_1(%arg0: i32, %arg1: i32) -> (i32, i32) {
    %c0_i32 = arith.constant 0 : i32
    %c0_i32_0 = arith.constant 0 : i32
    return %c0_i32, %arg1 : i32, i32
  }
  func.func @transform_2(%arg0: i32, %arg1: i32) -> (i32, i32) {
    %c0_i32 = arith.constant 0 : i32
    %c0_i32_0 = arith.constant 0 : i32
    return %c0_i32, %arg1 : i32, i32
  }
  func.func @transform_3(%arg0: i32, %arg1: i32) -> (i32, i32) {
    %c0_i32 = arith.constant 0 : i32
    return %arg0, %arg1 : i32, i32
  }
}

</mosaic_0001>

<bundles_post_ra>
// kernel: tpu_custom_call.1
= control target key start
LH: loop header
LB: loop body
LE: loop exit
PB: predicated region body
PF: predicated region fallthrough
CT: control target
= control target key end

     0   :  { %8 = vsyncpa [#allocation3], 0  ;;  %s247_s0 = inlined_call_operand.hbm [shape: f32[16,32], index: 0, kind: input, shape index: {}]   ;;  %s248_s1 = inlined_call_operand.hbm [shape: f32[32,128], index: 1, kind: input, shape index: {}]   ;;  %s249_s2 = inlined_call_operand.vmem [shape: f32[1,128], index: 2, kind: input, shape index: {}]   ;;  %s250_s3 = inlined_call_operand.hbm [shape: f32[16,128], index: 3, kind: output, shape index: {}]  }
   0x1   :  { %9 = vsyncpa [#allocation6], 0 }
   0x2   :  { %10 = vsyncpa [#allocation4], 0  ;;  %s15_s14 = sshll.u32 %s247_s0, 4  ;;  %s201_s15 = smov [#allocation2]   ;;  %s16_s14 = int_to_ptr.hbm [resolvable:$true] %s15_s14 }
   0x3   :  { %s17_s16 = sshll.u32 %s201_s15, 4  ;;  %s28_s19 = sshll.u32 %s248_s1, 4  ;;  %s18_s16 = int_to_ptr.vmem [resolvable:$true] %s17_s16  ;;  %s29_s19 = int_to_ptr.hbm [resolvable:$true] %s28_s19 }
   0x4   :  { %s202_s20 = smov 128   ;;  %s203_s21 = smov 8  }
   0x5   :  { %23 = dma.hbm_to_vmem [thread:$0]  %s16_s14, 256, %s18_s16, [#allocation3], %s202_s20, %s202_s20, %s203_s21  }
   0x6   :  { %s204_s22 = smov [#allocation5]  }
   0x7   :  { %s30_s23 = sshll.u32 %s204_s22, 4  ;;  %s31_s23 = int_to_ptr.vmem [resolvable:$true] %s30_s23 }
   0x8   :  { %36 = dma.hbm_to_vmem [thread:$0]  %s29_s19, 512, %s31_s23, [#allocation6], %s202_s20, %s202_s20, %s203_s21  }
   0x9   :  { %195 = dma.done.wait [#allocation3], 256  }
   0xa   :  { %196 = vsyncadd [#allocation3], 4294967040 }
   0xb   :  { %197 = dma.done.wait [#allocation6], 512  }
   0xc   :  { %198 = vsyncadd [#allocation6], 4294966784  ;;  %v52_v0 = vld [vmem:[#allocation5 + $0x18] sm:$0xff]  ;;  %v51_v1 = vld [vmem:[#allocation5 + $0x10] sm:$0xff]  ;;  %vm53_vm0 = vcmask 261120   ;;  %s205_s24 = smov [#allocation7]  }
   0xd   :  { %72 = vmatpush.msra.mxu0 %v52_v0  ;;  %113 = vmatpush.msra.mxu1 %v52_v0  ;;  %v50_v2 = vld [vmem:[#allocation5 + $0x8] sm:$0xff]  ;;  %v49_v3 = vld [vmem:[#allocation5] sm:$0xff]  ;;  %v47_v4 = vld [vmem:[#allocation2] sm:$0xff]  ;;  %s95_s25 = sshll.u32 %s205_s24, 4  ;;  %s97_s28 = sshll.u32 %s250_s3, 4  ;;  %s96_s25 = int_to_ptr.vmem [resolvable:$true] %s95_s25  ;;  %s98_s28 = int_to_ptr.hbm [resolvable:$true] %s97_s28 }
   0xe   :  { %v48_v5 = vld [vmem:[#allocation2 + $0x8] sm:$0xff]  ;;  %v122_v6 = vld [vmem:[%s249_s2] ss:$0 sm:$0xff] }
   0xf   :  { %73 = vmatpush.msra.mxu0 %v51_v1  ;;  %114 = vmatpush.msra.mxu1 %v51_v1 }
  0x11   :  { %74 = vmatpush.msra.mxu0 %v50_v2  ;;  %115 = vmatpush.msra.mxu1 %v50_v2 }
  0x13   :  { %75 = vmatpush.msra.mxu0 %v49_v3  ;;  %116 = vmatpush.msra.mxu1 %v49_v3 }
  0x14   :  { %111 = vmatmul.msk.f32.vlgmr.msra.gmra.mxu0 %vm53_vm0, %v47_v4  ;;  %112 = vmatmul.msk.f32.vlgmr.msra.gmra.mxu1 %vm53_vm0, %v48_v5 }
  0x91   :  { %v77_v7 = vpop.f32.mrf.mxu0  ;;  %v80_v8 = vpop.f32.mrf.mxu1 }
  0x92   :  { %v87_v9 = vmul.f32 %v122_v6, %v77_v7  ;;  %v88_v10 = vmul.f32 %v122_v6, %v80_v8 }
  0x94   :  { %89 = vst [vmem:[#allocation7] sm:$0xff] %v87_v9 }
  0x95   :  { %90 = vst [vmem:[#allocation7 + $0x8] sm:$0xff] %v88_v10 }
  0x96   :  { %103 = dma.vmem_to_hbm [thread:$0]  %s96_s25, 256, %s98_s28, [#allocation4], %s202_s20, %s202_s20, %s203_s21  }
  0x97   :  { %199 = dma.done.wait [#allocation4], 256  }
  0x98   :  { %200 = vsyncadd [#allocation4], 4294967040 }
  0x99   :  { %108 = vsyncpa [#allocation3], 1 }
  0x9a   :  { %109 = vsyncpa [#allocation6], 1 }
  0x9b   :  { %110 = vsyncpa [#allocation4], 1 }

</bundles_post_ra>
